<compile_context>
chip_gen: v6e
topology: v6e:2x2x1
jax: 0.10.0
libtpu: 0.0.40
codegen_flags: <defaults>
</compile_context>

<pallas_src>
import functools

import jax
import jax.numpy as jnp
from jax.experimental import pallas as pl
from jax.experimental.pallas import tpu as pltpu

_NEG_INF = -1e30


def _round_up(v, m):
    return (v + m - 1) // m * m


# ---------------------------------------------------------------------------
# Kernel 1: per-layer linear projection, tiled over node rows.
# ---------------------------------------------------------------------------
def _proj_kernel(x_ref, w_ref, asrc_ref, hf_ref, hb_ref, ssrc_ref):
    h = jnp.dot(x_ref[...], w_ref[...], preferred_element_type=jnp.float32)
    hf_ref[...] = h                              # f32 h (streamed per dst tile later)
    hb_ref[...] = h.astype(jnp.bfloat16)         # bf16 h for the aggregation matmul
    # a_src . h_j for every node of the tile, produced directly as a lane-major
    # row via an NT matmul (contract the feature dim of both operands).
    srow = jax.lax.dot_general(
        asrc_ref[...], h, (((1,), (1,)), ((), ())),
        preferred_element_type=jnp.float32)      # (8, tile)
    ssrc_ref[...] = srow[0:1, :]


def _projection(xin, w, a_src8, *, tm, compiler_params):
    n_pad, fin = xin.shape
    fp = w.shape[1]
    grid = (n_pad // tm,)
    return pl.pallas_call(
        _proj_kernel,
        out_shape=(
            jax.ShapeDtypeStruct((n_pad, fp), jnp.float32),
            jax.ShapeDtypeStruct((n_pad, fp), jnp.bfloat16),
            jax.ShapeDtypeStruct((1, n_pad), jnp.float32),
        ),
        grid=grid,
        in_specs=[
            pl.BlockSpec((tm, fin), lambda i: (i, 0)),   # x rows (streamed)
            pl.BlockSpec((fin, fp), lambda i: (0, 0)),   # W (resident)
            pl.BlockSpec((8, fp), lambda i: (0, 0)),     # a_src (tiled to 8 rows)
        ],
        out_specs=(
            pl.BlockSpec((tm, fp), lambda i: (i, 0)),
            pl.BlockSpec((tm, fp), lambda i: (i, 0)),
            pl.BlockSpec((1, tm), lambda i: (0, i)),
        ),
        compiler_params=compiler_params,
    )(xin, w, a_src8)


# ---------------------------------------------------------------------------
# Kernel 2: masked edge-softmax + aggregation, tiled over destination rows.
# ---------------------------------------------------------------------------
def _attn_kernel(adj_ref, hdst_ref, hall_ref, ssrc_ref, adst_ref, b_ref, out_ref,
                 *, activation, n_valid):
    # Compute the edge mask once per tile (int8 adjacency -> bool) and reuse it.
    mask = adj_ref[...].astype(jnp.float32) > 0.0                      # (tm, N)
    # Destination score a_dst . h_i for this tile (f32 logits).
    s_dst = jnp.sum(hdst_ref[...] * adst_ref[...], axis=-1, keepdims=True)  # (tm, 1)
    e = s_dst + ssrc_ref[...]                                          # (tm, N)
    e = jnp.maximum(e, 0.2 * e)                                        # LeakyReLU(0.2)
    e = jnp.where(mask, e, _NEG_INF)                                   # mask non-edges
    m = jnp.max(e, axis=-1, keepdims=True)                             # rows always have a self loop
    p = jnp.where(mask, jnp.exp(e - m), 0.0)
    inv = pl.reciprocal(jnp.sum(p, axis=-1, keepdims=True), approx=True)
    attn = (p * inv).astype(jnp.bfloat16)                              # softmax weights -> bf16
    out = jnp.dot(attn, hall_ref[...], preferred_element_type=jnp.float32)  # f32 accumulate
    out = out + b_ref[...]
    if activation == "relu":
        out = jnp.maximum(out, 0.0)
    elif activation == "log_softmax":
        lane = jax.lax.broadcasted_iota(jnp.int32, out.shape, 1)
        out = jnp.where(lane < n_valid, out, _NEG_INF)                 # ignore padded lanes
        z = out - jnp.max(out, axis=-1, keepdims=True)
        out = z - jnp.log(jnp.sum(jnp.exp(z), axis=-1, keepdims=True))
    out_ref[...] = out


def _attention(adj, hf, hb, ssrc, a_dst, bias, *, tm, activation, n_valid,
               compiler_params):
    n_pad = adj.shape[0]
    fp = hf.shape[1]
    grid = (n_pad // tm,)
    kernel = functools.partial(_attn_kernel, activation=activation, n_valid=n_valid)
    return pl.pallas_call(
        kernel,
        out_shape=jax.ShapeDtypeStruct((n_pad, fp), jnp.float32),
        grid=grid,
        in_specs=[
            pl.BlockSpec((tm, n_pad), lambda i: (i, 0)),   # int8 adjacency tile (streamed)
            pl.BlockSpec((tm, fp), lambda i: (i, 0)),      # f32 h rows of this dst tile
            pl.BlockSpec((n_pad, fp), lambda i: (0, 0)),   # bf16 h, all nodes (resident)
            pl.BlockSpec((1, n_pad), lambda i: (0, 0)),    # source-score row (resident)
            pl.BlockSpec((1, fp), lambda i: (0, 0)),       # a_dst
            pl.BlockSpec((1, fp), lambda i: (0, 0)),       # bias
        ],
        out_specs=pl.BlockSpec((tm, fp), lambda i: (i, 0)),
        compiler_params=compiler_params,
    )(adj, hf, hb, ssrc, a_dst, bias)


# ---------------------------------------------------------------------------
# Forward wrapper.
# ---------------------------------------------------------------------------
def gat_forward(x, edge_index, params, *, row_tile=256):
    """x: (N, in_channels) f32; edge_index: (2, E) int32 (row0 = src, row1 = dst)."""
    assert row_tile % 128 == 0
    n, in_c = x.shape
    hid = params["w1"].shape[1]
    out_c = params["w2"].shape[1]
    f1 = _round_up(hid, 128)          # lane-dense hidden width
    f2 = _round_up(out_c, 128)        # lane-dense output width

    # Destination-row tiling; 32-node padding keeps int8/bf16 sublane tiling happy.
    if n <= row_tile:
        n_pad = _round_up(n, 32)
        tm = n_pad
    else:
        tm = row_tile
        n_pad = _round_up(n, tm)

    # Zero-pad features / params (padded feature lanes stay exactly zero through
    # both layers; padded node rows only see their self loop).
    xp = jnp.zeros((n_pad, in_c), jnp.float32).at[:n].set(x.astype(jnp.float32))

    def pad2(a, shape):
        return jnp.zeros(shape, jnp.float32).at[: a.shape[0], : a.shape[1]].set(a)

    w1 = pad2(params["w1"], (in_c, f1))
    a1s8 = jnp.tile(pad2(params["a1_src"], (1, f1)), (8, 1))
    a1d = pad2(params["a1_dst"], (1, f1))
    b1 = pad2(params["b1"], (1, f1))
    w2 = pad2(params["w2"], (f1, f2))
    a2s8 = jnp.tile(pad2(params["a2_src"], (1, f2)), (8, 1))
    a2d = pad2(params["a2_dst"], (1, f2))
    b2 = pad2(params["b2"], (1, f2))

    # Dense int8 adjacency: adj[dst, src] = 1 iff edge src -> dst; self loops added
    # for every row (incl. padded nodes) so the edge softmax is always well defined.
    # NOTE: duplicate (parallel) edges collapse to a single 1 here, which differs
    # from PyG's per-edge softmax on multigraphs.
    src = edge_index[0].astype(jnp.int32)
    dst = edge_index[1].astype(jnp.int32)
    adj = jnp.zeros((n_pad, n_pad), jnp.int8)
    adj = adj.at[dst, src].set(1)
    diag = jnp.arange(n_pad)
    adj = adj.at[diag, diag].set(1)

    cp = pltpu.CompilerParams(
        dimension_semantics=("parallel",),          # dst tiles independent -> v7x megacore
        vmem_limit_bytes=64 * 1024 * 1024,          # explicit scoped-VMEM budget
    )

    # ---- layer 1 ----
    hf1, hb1, ss1 = _projection(xp, w1, a1s8, tm=tm, compiler_params=cp)
    h1 = _attention(adj, hf1, hb1, ss1, a1d, b1, tm=tm,
                    activation="relu", n_valid=hid, compiler_params=cp)
    # F.dropout(training=False) -> identity.

    # ---- layer 2 (+ fused log_softmax over the valid output lanes) ----
    hf2, hb2, ss2 = _projection(h1, w2, a2s8, tm=tm, compiler_params=cp)
    h2 = _attention(adj, hf2, hb2, ss2, a2d, b2, tm=tm,
                    activation="log_softmax", n_valid=out_c, compiler_params=cp)

    return h2[:n, :out_c]


# ---------------------------------------------------------------------------
# Params + pure-JAX reference (f32, dense mask formulation).
# ---------------------------------------------------------------------------
def _glorot(key, shape):
    fan_in, fan_out = shape[0], shape[-1]
    bound = (6.0 / (fan_in + fan_out)) ** 0.5
    return jax.random.uniform(key, shape, jnp.float32, -bound, bound)


def init_params(key, in_channels, hidden_channels, out_channels):
    ks = jax.random.split(key, 6)
    return {
        "w1":     _glorot(ks[0], (in_channels, hidden_channels)),
        "a1_src": _glorot(ks[1], (1, hidden_channels)),
        "a1_dst": _glorot(ks[2], (1, hidden_channels)),
        "b1":     jnp.zeros((1, hidden_channels), jnp.float32),
        "w2":     _glorot(ks[3], (hidden_channels, out_channels)),
        "a2_src": _glorot(ks[4], (1, out_channels)),
        "a2_dst": _glorot(ks[5], (1, out_channels)),
        "b2":     jnp.zeros((1, out_channels), jnp.float32),
    }


def _reference_forward(x, edge_index, params):
    import numpy as np
    n = x.shape[0]
    adj = np.zeros((n, n), np.float32)
    adj[np.asarray(edge_index[1]), np.asarray(edge_index[0])] = 1.0
    adj[np.arange(n), np.arange(n)] = 1.0
    adj = jnp.asarray(adj)

    def layer(h_in, w, a_s, a_d, b):
        h = h_in @ w
        e = (h @ a_d[0])[:, None] + (h @ a_s[0])[None, :]
        e = jnp.where(e > 0, e, 0.2 * e)
        e = jnp.where(adj > 0, e, -jnp.inf)
        attn = jax.nn.softmax(e, axis=-1)
        return attn @ h + b

    h1 = jax.nn.relu(layer(x, params["w1"], params["a1_src"], params["a1_dst"], params["b1"]))
    h2 = layer(h1, params["w2"], params["a2_src"], params["a2_dst"], params["b2"])
    return jax.nn.log_softmax(h2, axis=1)


if __name__ == "__main__":
    N, IN_C, HID_C, OUT_C = 16, 8, 32, 4

    key = jax.random.PRNGKey(0)
    kx, kp = jax.random.split(key)
    x = jax.random.normal(kx, (N, IN_C), jnp.float32)

    # deterministic small graph: bidirectional ring
    src = jnp.concatenate([jnp.arange(N), (jnp.arange(N) + 1) % N])
    dst = jnp.concatenate([(jnp.arange(N) + 1) % N, jnp.arange(N)])
    edge_index = jnp.stack([src, dst]).astype(jnp.int32)     # (2, 2N)

    params = init_params(kp, IN_C, HID_C, OUT_C)

    out = jax.block_until_ready(gat_forward(x, edge_index, params))
    ref = jax.block_until_ready(_reference_forward(x, edge_index, params))

    assert out.shape == (N, OUT_C)
    assert bool(jnp.all(jnp.isfinite(out)))
    # bf16 aggregation matmul + approx reciprocal -> compare with a loose tolerance
    max_err = float(jnp.max(jnp.abs(out - ref)))
    assert jnp.allclose(out, ref, atol=5e-2, rtol=5e-2), f"mismatch vs reference (max abs err {max_err})"

    print("KERNEL_OK")
</pallas_src>

<mosaic_0001>
module attributes {stable_mosaic.version = 11 : i64} {
  func.func @_proj_kernel(%arg0: i32, %arg1: memref<32x8xf32, #tpu.memory_space<vmem>>, %arg2: memref<8x128xf32, #tpu.memory_space<vmem>>, %arg3: memref<8x128xf32, #tpu.memory_space<vmem>>, %arg4: memref<32x128xf32, #tpu.memory_space<vmem>>, %arg5: memref<32x128xbf16, #tpu.memory_space<vmem>>, %arg6: memref<1x32xf32, #tpu.memory_space<vmem>>) attributes {dimension_semantics = [#tpu.dimension_semantics<parallel>], iteration_bounds = array<i64: 1>, scalar_prefetch = 0 : i64, scratch_operands = 0 : i64, tpu.core_type = #tpu.core_type<tc>, window_params = [{transform_indices = @transform_0, window_bounds = array<i64: 32, 8>}, {pipeline_mode = #tpu.pipeline_mode<synchronous>, transform_indices = @transform_1, window_bounds = array<i64: 8, 128>}, {pipeline_mode = #tpu.pipeline_mode<synchronous>, transform_indices = @transform_2, window_bounds = array<i64: 8, 128>}, {transform_indices = @transform_3, window_bounds = array<i64: 32, 128>}, {transform_indices = @transform_4, window_bounds = array<i64: 32, 128>}, {transform_indices = @transform_5, window_bounds = array<i64: 1, 32>}]} {
    %c0 = arith.constant 0 : index
    %c0_0 = arith.constant 0 : index
    %0 = vector.load %arg1[%c0, %c0_0] : memref<32x8xf32, #tpu.memory_space<vmem>>, vector<32x8xf32>
    %c0_1 = arith.constant 0 : index
    %c0_2 = arith.constant 0 : index
    %1 = vector.load %arg2[%c0_1, %c0_2] : memref<8x128xf32, #tpu.memory_space<vmem>>, vector<8x128xf32>
    %cst = arith.constant dense<0.000000e+00> : vector<32x128xf32>
    %2 = tpu.matmul %0, %1, %cst {dimension_numbers = #tpu.dot_dimension_numbers<[1], [0], [0], [1], [0, 0, 1, 1], [], []>} : vector<32x8xf32>, vector<8x128xf32>, vector<32x128xf32> -> vector<32x128xf32>
    %c0_3 = arith.constant 0 : index
    %c0_4 = arith.constant 0 : index
    %3 = vector.load %arg4[%c0_3, %c0_4] : memref<32x128xf32, #tpu.memory_space<vmem>>, vector<32x128xf32>
    tpu.vector_store %arg4[%c0_3, %c0_4], %2 {strides = array<i32>} : memref<32x128xf32, #tpu.memory_space<vmem>>, vector<32x128xf32>,
    %4 = arith.truncf %2 : vector<32x128xf32> to vector<32x128xbf16>
    %c0_5 = arith.constant 0 : index
    %c0_6 = arith.constant 0 : index
    %5 = vector.load %arg5[%c0_5, %c0_6] : memref<32x128xbf16, #tpu.memory_space<vmem>>, vector<32x128xbf16>
    tpu.vector_store %arg5[%c0_5, %c0_6], %4 {strides = array<i32>} : memref<32x128xbf16, #tpu.memory_space<vmem>>, vector<32x128xbf16>,
    %c0_7 = arith.constant 0 : index
    %c0_8 = arith.constant 0 : index
    %6 = vector.load %arg3[%c0_7, %c0_8] : memref<8x128xf32, #tpu.memory_space<vmem>>, vector<8x128xf32>
    %cst_9 = arith.constant dense<0.000000e+00> : vector<8x32xf32>
    %7 = tpu.matmul %6, %2, %cst_9 {dimension_numbers = #tpu.dot_dimension_numbers<[1], [1], [0], [0], [0, 0, 1, 0], [], []>} : vector<8x128xf32>, vector<32x128xf32>, vector<8x32xf32> -> vector<8x32xf32>
    %8 = vector.extract_strided_slice %7 {offsets = [0, 0], sizes = [1, 32], strides = [1, 1]} : vector<8x32xf32> to vector<1x32xf32>
    %c0_10 = arith.constant 0 : index
    %c0_11 = arith.constant 0 : index
    %9 = vector.load %arg6[%c0_10, %c0_11] : memref<1x32xf32, #tpu.memory_space<vmem>>, vector<1x32xf32>
    tpu.vector_store %arg6[%c0_10, %c0_11], %8 {strides = array<i32>} : memref<1x32xf32, #tpu.memory_space<vmem>>, vector<1x32xf32>,
    return
  }
  func.func @transform_0(%arg0: i32) -> (i32, i32) {
    %c0_i32 = arith.constant 0 : i32
    %c0_i32_0 = arith.constant 0 : i32
    return %arg0, %c0_i32 : i32, i32
  }
  func.func @transform_1(%arg0: i32) -> (i32, i32) {
    %c0_i32 = arith.constant 0 : i32
    %c0_i32_0 = arith.constant 0 : i32
    %c0_i32_1 = arith.constant 0 : i32
    return %c0_i32, %c0_i32_0 : i32, i32
  }
  func.func @transform_2(%arg0: i32) -> (i32, i32) {
    %c0_i32 = arith.constant 0 : i32
    %c0_i32_0 = arith.constant 0 : i32
    %c0_i32_1 = arith.constant 0 : i32
    return %c0_i32, %c0_i32_0 : i32, i32
  }
  func.func @transform_3(%arg0: i32) -> (i32, i32) {
    %c0_i32 = arith.constant 0 : i32
    %c0_i32_0 = arith.constant 0 : i32
    return %arg0, %c0_i32 : i32, i32
  }
  func.func @transform_4(%arg0: i32) -> (i32, i32) {
    %c0_i32 = arith.constant 0 : i32
    %c0_i32_0 = arith.constant 0 : i32
    return %arg0, %c0_i32 : i32, i32
  }
  func.func @transform_5(%arg0: i32) -> (i32, i32) {
    %c0_i32 = arith.constant 0 : i32
    %c0_i32_0 = arith.constant 0 : i32
    return %c0_i32, %arg0 : i32, i32
  }
}

</mosaic_0001>

<bundles_post_ra>
// kernel: tpu_custom_call.1
= control target key start
LH: loop header
LB: loop body
LE: loop exit
PB: predicated region body
PF: predicated region fallthrough
CT: control target
= control target key end

     0   :  { %11 = vsyncpa [#allocation3], 0  ;;  %vm24_vm0 = vcmask 64512   ;;  %s455_s0 = inlined_call_operand.vmem [shape: f32[32,8], index: 0, kind: input, shape index: {}]   ;;  %s456_s1 = inlined_call_operand.vmem [shape: f32[8,128], index: 1, kind: input, shape index: {}]   ;;  %s457_s2 = inlined_call_operand.vmem [shape: f32[8,128], index: 2, kind: input, shape index: {}]   ;;  %s458_s3 = inlined_call_operand.hbm [shape: f32[32,128], index: 3, kind: output, shape index: {0}]   ;;  %s459_s4 = inlined_call_operand.hbm [shape: bf16[32,128], index: 4, kind: output, shape index: {1}]   ;;  %s460_s5 = inlined_call_operand.hbm [shape: f32[1,32], index: 5, kind: output, shape index: {2}]  }
   0x1   :  { %v23_v0 = vld [vmem:[%s456_s1] sm:$0xff]  ;;  %v20_v2 = vld [vmem:[%s455_s0 + $0x8] sm:$0xff]  ;;  %v21_v3 = vld [vmem:[%s455_s0 + $0x10] sm:$0xff] }
   0x2   :  { %v19_v1 = vld [vmem:[%s455_s0] sm:$0xff]  ;;  %297 = vmatprep.subr.mxu0 %v23_v0 }
   0x3   :  { %299 = vmatprep.mubr.msk.f32.mxu0 %vm24_vm0, %v19_v1 }
   0x4   :  { %12 = vsyncpa [#allocation5], 0  ;;  %298 = vmatpush3.msra.mxu0 %v23_v0  ;;  %v22_v4 = vld [vmem:[%s455_s0 + $0x18] sm:$0xff]  ;;  %v389_v5 = vmov 0.0   ;;  %vm390_vm1 = vmmov 0   ;;  %v146_v12 = vld [vmem:[%s457_s2] sm:$0xff] }
   0x5   :  { %300 = vmatmul.mubr.msk.f32.vlgmr.msra.gmra.mxu0 %vm24_vm0, %v20_v2  ;;  %305 = vmatprep.subr.mxu1 %v389_v5  ;;  %s391_s28 = smov [#allocation4]   ;;  %s392_s30 = smov [#allocation2]  }
   0x6   :  { %302 = vmatprep.mubr.msk.f32.mxu0 %vm24_vm0, %v21_v3  ;;  %313 = vmatprep.mubr.msk.f32.mxu1 %vm390_vm1, %v389_v5  ;;  %s236_s29 = sshll.u32 %s391_s28, 4  ;;  %s224_s6 = sshll.u32 %s392_s30, 4  ;;  %s237_s29 = int_to_ptr.vmem [resolvable:$true] %s236_s29  ;;  %s225_s6 = int_to_ptr.vmem [resolvable:$true] %s224_s6 }
   0x7   :  { %s325_s7 = scalar_lea.vmem %s237_s29, 256  ;;  %p330_p1 = scmp.lt.s32.totalorder %s237_s29, %s237_s29 }
   0x8   :  { %p326_p0 = scmp.ne.s32.totalorder %s237_s29, %s325_s7  ;;  %p331_p2 = scmp.lt.s32.totalorder %s325_s7, %s325_s7 }
   0x9   :  { %303 = vmatmul.mubr.msk.f32.gmra.mxu0 %vm24_vm0, %v22_v4 }
   0xa   :  { %p332_p3 = por %p331_p2, %p330_p1 }
   0xc   :  { %p333_p4 = pnand %p332_p3, %p326_p0 }
  0xc5   :  { %v301_v6 = vpop.f32.mrf.mxu0 }
  0xc6   :  { %123 = vst [vmem:[#allocation2 + $0x8] sm:$0xff] %v301_v6 }
  0xc7   :  { %v103_v7 = vpop.f32.mrf.mxu0 }
  0xc8   :  { %122 = vst [vmem:[#allocation2] sm:$0xff] %v103_v7  ;;  %v279_v8 = vpack.c.bf16 %v301_v6, %v103_v7 }
  0xc9   :  { %v304_v9 = vpop.f32.mrf.mxu0 }
  0xca   :  { %280 = vst [vmem:[#allocation4] sm:$0xff] %v279_v8   ;;  %125 = vst [vmem:[#allocation2 + $0x18] sm:$0xff] %v304_v9  ;;  %306 = vmatpush3.xpose.msra.mxu1 %v304_v9 }
  0xcb   :  { %v113_v10 = vpop.f32.mrf.mxu0  ;;  %307 = vmatprep.subr.mxu1 %v389_v5 }
  0xcc   :  { %124 = vst [vmem:[#allocation2 + $0x10] sm:$0xff] %v113_v10  ;;  %v284_v11 = vpack.c.bf16 %v304_v9, %v113_v10 }
  0xce   :  { %286 = vst [vmem:[#allocation4 + $0x8] sm:$0xff] %v284_v11   ;;  %308 = vmatpush3.xpose.msra.mxu1 %v113_v10 }
  0xcf   :  { %309 = vmatprep.subr.mxu1 %v389_v5 }
  0xd2   :  { %310 = vmatpush3.xpose.msra.mxu1 %v301_v6 }
  0xd3   :  { %311 = vmatprep.subr.mxu1 %v389_v5 }
  0xd6   :  { %312 = vmatpush3.xpose.msra.mxu1 %v103_v7 }
  0xd9   :  { %314 = vmatmul.mubr.f32.vlgmr.msra.gmra.mxu1 %v146_v12 }
  0xda   :  { %336 = shalt.err (!%p333_p4)
}
  0xdb   :  { %s393_s8 = smov 64   ;;  %s394_s9 = smov 4  }
  0xdc   :  { %242 = dma.vmem_to_hbm [thread:$0]  %s237_s29, 256, %s459_s4, [#allocation5], %s393_s8, %s393_s8, %s394_s9  }
  0xdd   :  { %s345_s2 = scalar_lea.vmem %s225_s6, 512  ;;  %p350_p6 = scmp.lt.s32.totalorder %s225_s6, %s225_s6 }
  0xde   :  { %p346_p5 = scmp.ne.s32.totalorder %s225_s6, %s345_s2  ;;  %p351_p7 = scmp.lt.s32.totalorder %s345_s2, %s345_s2 }
  0xe0   :  { %p352_p8 = por %p351_p7, %p350_p6 }
  0xe2   :  { %p353_p9 = pnand %p352_p8, %p346_p5 }
  0xe4   :  { %356 = shalt.err (!%p353_p9)
}
  0xe5   :  { %s395_s12 = smov 128   ;;  %s396_s13 = smov 8   ;;  %vm217_vm2 = vcmask 253952  }
  0xe6   :  { %230 = dma.vmem_to_hbm [thread:$0]  %s225_s6, 512, %s458_s3, [#allocation3], %s395_s12, %s395_s12, %s396_s13  }
  0xe7   :  { %s397_s16 = smov [#allocation6]  }
  0xe8   :  { %s249_s17 = sshll.u32 %s397_s16, 4  ;;  %s250_s17 = int_to_ptr.vmem [resolvable:$true] %s249_s17 }
  0xe9   :  { %s365_s4 = scalar_lea.vmem %s250_s17, 16  ;;  %s369_s18 = scalar_lea.vmem %s250_s17, 32 }
  0xea   :  { %p366_p10 = scmp.ne.s32.totalorder %s250_s17, %s365_s4  ;;  %p370_p11 = scmp.lt.s32.totalorder %s250_s17, %s250_s17 }
  0xeb   :  { %p371_p12 = scmp.lt.s32.totalorder %s369_s18, %s365_s4 }
  0xed   :  { %p372_p13 = por %p371_p12, %p370_p11 }
  0xef   :  { %p373_p0 = pnand %p372_p13, %p366_p10 }
 0x199   :  { %v213_v13 = vpop.f32.mrf.mxu1 }
 0x19a   :  { %218 = vst.msk [vmem:[#allocation6] sm:$0x1] %vm217_vm2, %v213_v13 }
 0x19b   :  { %v315_v14 = vpop.f32.mrf.mxu1 }
 0x19c   :  { %376 = shalt.err (!%p373_p0)
}
 0x19d   :  { %252 = dma.vmem_to_hbm [thread:$0]  %s250_s17, 16, %s460_s5, [#allocation5]  }
 0x19e   :  { %385 = dma.done.wait [#allocation3], 512  }
 0x19f   :  { %386 = vsyncadd [#allocation3], 4294966784 }
 0x1a0   :  { %387 = dma.done.wait [#allocation5], 272  }
 0x1a1   :  { %388 = vsyncadd [#allocation5], 4294967024 }
 0x1a2   :  { %262 = vsyncpa [#allocation3], 1 }
 0x1a3   :  { %263 = vsyncpa [#allocation5], 1 }

</bundles_post_ra>
